<compile_context>
chip_gen: v7x
topology: tpu7x:2x2x1
jax: 0.10.0
libtpu: 0.0.40
codegen_flags: <defaults>
</compile_context>

<pallas_src>
import jax
import jax.numpy as jnp
from jax.experimental import pallas as pl
from jax.experimental.pallas import tpu as pltpu


def _round_up(x, m):
    return ((x + m - 1) // m) * m


def neighbour_disp_kernel(d_ref, w_ref, out_ref):
    """One MXU matmul per row tile.

    d_ref   : (TM, K)        packed [dl | dr], columns = c*3 + v (zero-padded to K)
    w_ref   : (K, 3*dim_v)   effective weights, 0.3 folded in; columns = o*3 + v
    out_ref : (TM, 3*dim_v)  lanes = o*3 + v
    """
    out_ref[...] = jnp.dot(
        d_ref[...], w_ref[...], preferred_element_type=jnp.float32
    ).astype(out_ref.dtype)


def neighbour_disp_embed(pos_0, pos_1, pos_2, W_l, W_r, *, tm=2048):
    """pos_*: (B, N, 3);  W_l, W_r: (dim_v, 3)  ->  (B, N, dim_v, 3)."""
    B, N, _ = pos_0.shape
    dim_v = W_l.shape[0]
    M = B * N

    # ---- wrapper-side chain stencil (elementwise; keeps kernel tiling flat) ----
    def diff(p):
        return (p[:, 1:] - p[:, :-1]).astype(jnp.float32)

    delta = jnp.stack([diff(pos_0), diff(pos_1), diff(pos_2)], axis=2)   # (B, N-1, 3, 3)
    dl = jnp.pad(delta, ((0, 0), (0, 1), (0, 0), (0, 0))).reshape(M, 9)  # zero at node N-1
    dr = jnp.pad(delta, ((0, 0), (1, 0), (0, 0), (0, 0))).reshape(M, 9)  # zero at node 0
    din = jnp.concatenate([dl, dr], axis=1)                              # (M, 18)

    # ---- effective weight matrix: W_big[c*3+v, o*3+v] = 0.3*W_{l/r}[o, c] ----
    eye3 = jnp.eye(3, dtype=jnp.float32)
    w_big = jnp.concatenate(
        [jnp.kron(0.3 * W_l.T.astype(jnp.float32), eye3),
         jnp.kron(0.3 * W_r.T.astype(jnp.float32), eye3)], axis=0)       # (18, 3*dim_v)

    # pad contraction dim to a multiple of 8 for clean MXU operand layout
    K = _round_up(w_big.shape[0], 8)                                     # 24
    din = jnp.pad(din, ((0, 0), (0, K - 18)))
    w_big = jnp.pad(w_big, ((0, K - 18), (0, 0)))

    # ---- row tiling (large tile, clamped for small problems, multiple of 8) ----
    tm_eff = min(tm, _round_up(M, 8))
    tm_eff = _round_up(tm_eff, 8)
    Mp = _round_up(M, tm_eff)
    if Mp != M:
        din = jnp.pad(din, ((0, Mp - M), (0, 0)))

    out_flat = pl.pallas_call(
        neighbour_disp_kernel,
        out_shape=jax.ShapeDtypeStruct((Mp, 3 * dim_v), jnp.float32),
        grid_spec=pltpu.PrefetchScalarGridSpec(
            num_scalar_prefetch=0,
            grid=(Mp // tm_eff,),
            in_specs=[
                pl.BlockSpec((tm_eff, K), lambda i: (i, 0)),
                pl.BlockSpec((K, 3 * dim_v), lambda i: (0, 0)),
            ],
            out_specs=pl.BlockSpec((tm_eff, 3 * dim_v), lambda i: (i, 0)),
        ),
        compiler_params=pltpu.CompilerParams(
            dimension_semantics=("parallel",)),
    )(din, w_big)

    # lanes already ordered o*3+v  ->  direct reshape, no transpose
    return out_flat[:M].reshape(B, N, dim_v, 3)


def ref_neighbour_disp_embed(pos_0, pos_1, pos_2, W_l, W_r):
    """Plain-JAX reference mirroring the PyTorch forward."""
    delta = jnp.stack([pos_0[:, 1:] - pos_0[:, :-1],
                       pos_1[:, 1:] - pos_1[:, :-1],
                       pos_2[:, 1:] - pos_2[:, :-1]], axis=2)            # (B, N-1, 3, 3)
    delta_l = jnp.pad(delta, ((0, 0), (0, 1), (0, 0), (0, 0)))
    delta_r = jnp.pad(delta, ((0, 0), (1, 0), (0, 0), (0, 0)))
    return 0.3 * (jnp.einsum('bncv,oc->bnov', delta_l, W_l)
                  + jnp.einsum('bncv,oc->bnov', delta_r, W_r))


if __name__ == "__main__":
    key = jax.random.PRNGKey(0)
    k0, k1, k2, kwl, kwr = jax.random.split(key, 5)

    B, N = 2, 16          # batch, nodes
    dim_v = 32

    pos_0 = jax.random.normal(k0, (B, N, 3), dtype=jnp.float32)
    pos_1 = jax.random.normal(k1, (B, N, 3), dtype=jnp.float32)
    pos_2 = jax.random.normal(k2, (B, N, 3), dtype=jnp.float32)

    # deterministic synthetic TensLinear(rank=1) weights (no bias: equivariant)
    W_l = 0.5 * jax.random.normal(kwl, (dim_v, 3), dtype=jnp.float32)
    W_r = 0.5 * jax.random.normal(kwr, (dim_v, 3), dtype=jnp.float32)

    out = neighbour_disp_embed(pos_0, pos_1, pos_2, W_l, W_r, tm=2048)
    out = jax.block_until_ready(out)

    ref = ref_neighbour_disp_embed(pos_0, pos_1, pos_2, W_l, W_r)

    assert out.shape == (B, N, dim_v, 3), out.shape
    assert jnp.allclose(out, ref, atol=1e-5, rtol=1e-5)

    print("KERNEL_OK")
</pallas_src>

<mosaic_0001>
module attributes {stable_mosaic.version = 11 : i64} {
  func.func @neighbour_disp_kernel(%arg0: i32, %arg1: memref<32x24xf32, #tpu.memory_space<vmem>>, %arg2: memref<24x96xf32, #tpu.memory_space<vmem>>, %arg3: memref<32x96xf32, #tpu.memory_space<vmem>>) attributes {dimension_semantics = [#tpu.dimension_semantics<parallel>], iteration_bounds = array<i64: 1>, scalar_prefetch = 0 : i64, scratch_operands = 0 : i64, tpu.core_type = #tpu.core_type<tc>, window_params = [{transform_indices = @transform_0, window_bounds = array<i64: 32, 24>}, {pipeline_mode = #tpu.pipeline_mode<synchronous>, transform_indices = @transform_1, window_bounds = array<i64: 24, 96>}, {transform_indices = @transform_2, window_bounds = array<i64: 32, 96>}]} {
    %c0 = arith.constant 0 : index
    %c0_0 = arith.constant 0 : index
    %0 = vector.load %arg1[%c0, %c0_0] : memref<32x24xf32, #tpu.memory_space<vmem>>, vector<32x24xf32>
    %c0_1 = arith.constant 0 : index
    %c0_2 = arith.constant 0 : index
    %1 = vector.load %arg2[%c0_1, %c0_2] : memref<24x96xf32, #tpu.memory_space<vmem>>, vector<24x96xf32>
    %cst = arith.constant dense<0.000000e+00> : vector<32x96xf32>
    %2 = tpu.matmul %0, %1, %cst {dimension_numbers = #tpu.dot_dimension_numbers<[1], [0], [0], [1], [0, 0, 1, 1], [], []>} : vector<32x24xf32>, vector<24x96xf32>, vector<32x96xf32> -> vector<32x96xf32>
    %c0_3 = arith.constant 0 : index
    %c0_4 = arith.constant 0 : index
    %3 = vector.load %arg3[%c0_3, %c0_4] : memref<32x96xf32, #tpu.memory_space<vmem>>, vector<32x96xf32>
    tpu.vector_store %arg3[%c0_3, %c0_4], %2 {strides = array<i32>} : memref<32x96xf32, #tpu.memory_space<vmem>>, vector<32x96xf32>,
    return
  }
  func.func @transform_0(%arg0: i32) -> (i32, i32) {
    %c0_i32 = arith.constant 0 : i32
    %c0_i32_0 = arith.constant 0 : i32
    return %arg0, %c0_i32 : i32, i32
  }
  func.func @transform_1(%arg0: i32) -> (i32, i32) {
    %c0_i32 = arith.constant 0 : i32
    %c0_i32_0 = arith.constant 0 : i32
    %c0_i32_1 = arith.constant 0 : i32
    return %c0_i32, %c0_i32_0 : i32, i32
  }
  func.func @transform_2(%arg0: i32) -> (i32, i32) {
    %c0_i32 = arith.constant 0 : i32
    %c0_i32_0 = arith.constant 0 : i32
    return %arg0, %c0_i32 : i32, i32
  }
}

</mosaic_0001>

<bundles_post_ra>
// kernel: tpu_custom_call.1
= control target key start
LH: loop header
LB: loop body
LE: loop exit
PB: predicated region body
PF: predicated region fallthrough
CT: control target
= control target key end

     0   :  { %vm19_vm0 = vcmask 195584   ;;  %s251_s0 = inlined_call_operand.vmem [shape: f32[32,24], index: 0, kind: input, shape index: {}]   ;;  %s252_s1 = inlined_call_operand.vmem [shape: f32[24,96], index: 1, kind: input, shape index: {}]   ;;  %s253_s2 = inlined_call_operand.hbm [shape: f32[32,96], index: 2, kind: output, shape index: {}]  }
   0x1   :  { %v16_v0 = vld [vmem:[%s252_s1] sm:$0xff]  ;;  %v17_v1 = vld [vmem:[%s252_s1 + $0x8] sm:$0xff]  ;;  %v14_v4 = vld [vmem:[%s251_s0 + $0x10] sm:$0xff] }
   0x2   :  { %v161_v2 = vpack.c.bf16 %v17_v1, %v16_v0  ;;  %v12_v3 = vld [vmem:[%s251_s0] sm:$0xff]  ;;  %v18_v5 = vld [vmem:[%s252_s1 + $0x10] sm:$0xff]  ;;  %158 = vmatprep.mubr.msk.f32.mxu1 %vm19_vm0, %v14_v4 }
   0x3   :  { %155 = vmatprep.mubr.msk.f32.mxu0 %vm19_vm0, %v12_v3 }
   0x4   :  { %7 = vsyncpa [#allocation3], 0  ;;  %162 = vmatprep.subr.bf16.mxu0 %v161_v2  ;;  %165 = vmatprep.subr.bf16.mxu1 %v161_v2  ;;  %v13_v6 = vld [vmem:[%s251_s0 + $0x8] sm:$0xff]  ;;  %v15_v7 = vld [vmem:[%s251_s0 + $0x18] sm:$0xff]  ;;  %s196_s1 = smov [#allocation2]   ;;  %vm117_vm1 = vcmask 785408  }
   0x5   :  { %164 = vmatpush3.bf16.msra.mxu0 %v161_v2  ;;  %167 = vmatpush3.bf16.msra.mxu1 %v161_v2  ;;  %s127_s23 = sshll.u32 %s196_s1, 4  ;;  %s128_s23 = int_to_ptr.vmem [resolvable:$true] %s127_s23 }
   0x6   :  { %153 = vmatprep.subr.mxu0 %v18_v5  ;;  %166 = vmatprep.subr.mxu1 %v18_v5  ;;  %s172_s24 = scalar_lea.vmem %s128_s23, 512  ;;  %p177_p1 = scmp.lt.s32.totalorder %s128_s23, %s128_s23 }
   0x7   :  { %p173_p0 = scmp.ne.s32.totalorder %s128_s23, %s172_s24  ;;  %p178_p2 = scmp.lt.s32.totalorder %s172_s24, %s172_s24 }
   0x9   :  { %154 = vmatpush3.msra.mxu0 %v18_v5  ;;  %168 = vmatpush3.msra.mxu1 %v18_v5  ;;  %p179_p3 = por %p178_p2, %p177_p1 }
   0xa   :  { %156 = vmatmul.mubr.msk.f32.vlgmr.msra.gmra.mrb[0].mxu0 %vm19_vm0, %v13_v6  ;;  %159 = vmatmul.mubr.msk.f32.vlgmr.msra.gmra.mrb[0].mxu1 %vm19_vm0, %v15_v7 }
   0xb   :  { %p180_p4 = pnand %p179_p3, %p173_p0 }
  0xdd   :  { %v157_v8 = vpop.f32.mrb[0].mxu0  ;;  %v160_v9 = vpop.f32.mrb[0].mxu1 }
  0xde   :  { %119 = vst.msk [vmem:[#allocation2 + $0x8] sm:$0xff] %vm117_vm1, %v157_v8  ;;  %121 = vst.msk [vmem:[#allocation2 + $0x18] sm:$0xff] %vm117_vm1, %v160_v9  ;;  %v98_v10 = vpop.f32.mrb[1].mxu0  ;;  %v108_v11 = vpop.f32.mrb[1].mxu1 }
  0xdf   :  { %118 = vst.msk [vmem:[#allocation2] sm:$0xff] %vm117_vm1, %v98_v10  ;;  %120 = vst.msk [vmem:[#allocation2 + $0x10] sm:$0xff] %vm117_vm1, %v108_v11 }
  0xe0   :  { %183 = shalt.err (!%p180_p4)
}
  0xe1   :  { %s184_s26 = scalar_lea.hbm %s253_s2, 512 }
  0xe2   :  { %p185_p5 = scmp.ne.s32.totalorder %s253_s2, %s184_s26  ;;  %p188_p6 = scmp.lt.u32.totalorder %s184_s26, %s253_s2 }
  0xe4   :  { %p190_p7 = pnand %p188_p6, %p185_p5 }
  0xe6   :  { %193 = shalt.err (!%p190_p7)
}
  0xe7   :  { %s197_s3 = smov 128   ;;  %s198_s4 = smov 8  }
  0xe8   :  { %133 = dma.vmem_to_hbm [thread:$0]  %s128_s23, 512, %s253_s2, [#allocation3], %s197_s3, %s197_s3, %s198_s4  }
  0xe9   :  { %194 = dma.done.wait [#allocation3], 512  }
  0xea   :  { %195 = vsyncadd [#allocation3], 4294966784 }
  0xeb   :  { %137 = vsyncpa [#allocation3], 1 }

</bundles_post_ra>
